<compile_context>
chip_gen: v6e
topology: v6e:2x2x1
jax: 0.10.0
libtpu: 0.0.40
codegen_flags: <defaults>
</compile_context>

<pallas_src>
import functools

import jax
import jax.numpy as jnp
from jax import lax
from jax.experimental import pallas as pl
from jax.experimental.pallas import tpu as pltpu


def _round_up(x, m):
    return ((x + m - 1) // m) * m


def _round_down(x, m):
    return (x // m) * m


def _vmem_capacity_bytes():
    try:
        return int(pltpu.get_tpu_info().vmem_capacity_bytes)
    except Exception:
        return 128 << 20  # v5e/v6e default if query is unavailable


def _pooler_kernel(x_ref, wt_ref, b_ref, o_ref, *, compute_dtype, row_chunks):
    """One (TM, TN) output tile of tanh(x @ W^T + b).

    x_ref : (TM, Hp) activations in their ORIGINAL dtype (cast fused in-kernel)
    wt_ref: (Hp, TN) pre-transposed weight (W^T) in compute dtype
    b_ref : (1, TN)  bias, fp32
    o_ref : (TM, TN) output
    """
    wt = wt_ref[...]
    b = b_ref[...]
    tm = x_ref.shape[0]
    ch = tm // row_chunks
    out_bf16 = o_ref.dtype == jnp.bfloat16

    # Static row sub-chunks: MXU work of chunk c+1 overlaps the EUP tanh /
    # VPU cast / vector-store epilogue of chunk c.
    for c in range(row_chunks):
        rows = slice(c * ch, (c + 1) * ch)
        x = x_ref[rows, :].astype(compute_dtype)          # fused activation cast
        acc = lax.dot_general(
            x, wt,
            dimension_numbers=(((1,), (0,)), ((), ())),   # plain x @ W^T, no vxpose
            preferred_element_type=jnp.float32,
        )
        acc = acc + b                                      # bias add in fp32
        if out_bf16:
            acc = acc.astype(jnp.bfloat16)                 # cheaper tanh + store
        o_ref[rows, :] = jnp.tanh(acc).astype(o_ref.dtype)


@functools.partial(jax.jit, static_argnames=("compute_dtype", "tm", "tn"))
def pooler_all(hidden_states, weight, bias, *, compute_dtype=jnp.bfloat16,
               tm=None, tn=None):
    """hidden_states: (B, S, H); weight: (H, H) nn.Linear (out, in); bias: (H,)."""
    B, S, H = hidden_states.shape
    M = B * S
    x_dtype = hidden_states.dtype
    out_dtype = x_dtype
    c_bytes = jnp.dtype(compute_dtype).itemsize
    x_bytes = jnp.dtype(x_dtype).itemsize
    o_bytes = jnp.dtype(out_dtype).itemsize

    Hp = _round_up(H, 128)        # lane-dense loads/stores, full MXU width
    Mp = _round_up(M, 16)         # sublane packing (covers fp32 and bf16 inputs)

    # ---- generation-aware VMEM budget --------------------------------------
    cap = _vmem_capacity_bytes()
    if cap <= (64 << 20):                               # v7x: leave compiler headroom
        usable = max(int(cap - (8 << 20)), 32 << 20)
    else:                                               # v5e/v6e: 128 MiB physical
        usable = int(min(cap - (16 << 20), 110 << 20))

    # ---- tile sizes ---------------------------------------------------------
    # Output-column tile: full H when the double-buffered resident W^T slice
    # fits in half the budget; shrink for huge H (critical on v7x).
    if tn is None:
        TN = 128
        for cand in (Hp, 4096, 2048, 1024, 512, 256, 128):
            cand = min(cand, Hp)
            if 2 * Hp * cand * c_bytes <= usable // 2:
                TN = cand
                break
    else:
        TN = min(_round_up(min(tn, Hp), 128), Hp)

    # Row tile: as large as the remaining VMEM allows (amortize per-step cost).
    remaining = max(usable - 2 * Hp * TN * c_bytes - 4 * TN * 4, 0)
    per_row = 2 * Hp * x_bytes + 2 * TN * o_bytes        # double-buffered x + out
    tm_fit = max(_round_down(remaining // per_row, 16), 16)
    tm_target = tm if tm is not None else (1024 if Hp <= 2048 else 512)
    TM = min(_round_up(tm_target, 16), tm_fit, Mp)

    # In-kernel row sub-chunking for epilogue/MXU overlap.
    row_chunks = 1
    for rc in (4, 2):
        if TM % rc == 0 and (TM // rc) % 16 == 0 and (TM // rc) >= 128:
            row_chunks = rc
            break

    # ---- operand prep (one-time, amortized over M*H work) ------------------
    x2d = hidden_states.reshape(M, H)                    # stays in original dtype
    if (Mp, Hp) != (M, H):
        x2d = jnp.pad(x2d, ((0, Mp - M), (0, Hp - H)))
    wt = weight.T                                        # one-time transpose (in, out)
    if Hp != H:
        wt = jnp.pad(wt, ((0, Hp - H), (0, Hp - H)))
    wt = wt.astype(compute_dtype)
    b2d = bias.reshape(1, H).astype(jnp.float32)
    if Hp != H:
        b2d = jnp.pad(b2d, ((0, 0), (0, Hp - H)))

    # ---- grid: N (weight tile) OUTER so W^T is DMA'd once per N tile and stays
    # resident across every row tile; M inner + "parallel" so megacore sharding
    # splits rows (each TensorCore keeps its own small weight copy).
    grid = (pl.cdiv(Hp, TN), pl.cdiv(Mp, TM))

    vmem_est = (2 * TM * Hp * x_bytes + 2 * TM * TN * o_bytes
                + 2 * Hp * TN * c_bytes + 4 * TN * 4 + (2 << 20))
    vmem_limit = int(min(max(vmem_est, 16 << 20), usable))

    kernel = functools.partial(_pooler_kernel, compute_dtype=compute_dtype,
                               row_chunks=row_chunks)

    out2d = pl.pallas_call(
        kernel,
        out_shape=jax.ShapeDtypeStruct((Mp, Hp), out_dtype),
        grid_spec=pltpu.PrefetchScalarGridSpec(
            num_scalar_prefetch=0,
            grid=grid,
            in_specs=[
                pl.BlockSpec((TM, Hp), lambda j, i: (i, 0)),   # activations: row tiles
                pl.BlockSpec((Hp, TN), lambda j, i: (0, j)),   # W^T: resident per N tile
                pl.BlockSpec((1, TN), lambda j, i: (0, j)),    # bias: resident per N tile
            ],
            out_specs=pl.BlockSpec((TM, TN), lambda j, i: (i, j)),
        ),
        compiler_params=pltpu.CompilerParams(
            dimension_semantics=("arbitrary", "parallel"),
            vmem_limit_bytes=vmem_limit,
        ),
        cost_estimate=pl.CostEstimate(
            flops=2 * Mp * Hp * Hp,
            transcendentals=Mp * Hp,
            bytes_accessed=(Mp * Hp * x_bytes + Hp * Hp * c_bytes
                            + Mp * Hp * o_bytes + Hp * 4),
        ),
    )(x2d, wt, b2d)

    return out2d[:M, :H].reshape(B, S, H)


if __name__ == "__main__":
    # Small, deterministic setup consistent with the module: batch=2, seq=8, hidden=32.
    B, S, H = 2, 8, 32
    key = jax.random.PRNGKey(0)
    k_x, k_w, k_b = jax.random.split(key, 3)

    hidden_states = jax.random.normal(k_x, (B, S, H), dtype=jnp.float32)
    # nn.Linear(H, H): weight (H_out, H_in), bias (H,); deterministic synthetic init.
    weight = jax.random.normal(k_w, (H, H), dtype=jnp.float32) * 0.05
    bias = jax.random.normal(k_b, (H,), dtype=jnp.float32) * 0.05

    ref = jnp.tanh(hidden_states @ weight.T + bias)

    # 1) fp32 MXU operands: exact-path correctness check.
    out_f32 = pooler_all(hidden_states, weight, bias, compute_dtype=jnp.float32)
    out_f32 = jax.block_until_ready(out_f32)
    assert out_f32.shape == (B, S, H)
    assert jnp.allclose(out_f32, ref, atol=1e-5, rtol=1e-5)

    # 2) default bf16 MXU operands with fp32 accumulation (production fast path).
    out_bf16 = pooler_all(hidden_states, weight, bias)
    out_bf16 = jax.block_until_ready(out_bf16)
    assert out_bf16.shape == (B, S, H)
    assert jnp.allclose(out_bf16, ref, atol=3e-2, rtol=3e-2)

    print("KERNEL_OK")
</pallas_src>

<mosaic_0001>
module attributes {stable_mosaic.version = 11 : i64} {
  func.func @_pooler_kernel(%arg0: i32, %arg1: i32, %arg2: memref<16x128xf32, #tpu.memory_space<vmem>>, %arg3: memref<128x128xf32, #tpu.memory_space<vmem>>, %arg4: memref<1x128xf32, #tpu.memory_space<vmem>>, %arg5: memref<16x128xf32, #tpu.memory_space<vmem>>) attributes {dimension_semantics = [#tpu.dimension_semantics<arbitrary>, #tpu.dimension_semantics<parallel>], iteration_bounds = array<i64: 1, 1>, scalar_prefetch = 0 : i64, scratch_operands = 0 : i64, tpu.core_type = #tpu.core_type<tc>, window_params = [{transform_indices = @transform_0, window_bounds = array<i64: 16, 128>}, {transform_indices = @transform_1, window_bounds = array<i64: 128, 128>}, {transform_indices = @transform_2, window_bounds = array<i64: 1, 128>}, {transform_indices = @transform_3, window_bounds = array<i64: 16, 128>}]} {
    %c0 = arith.constant 0 : index
    %c0_0 = arith.constant 0 : index
    %0 = vector.load %arg3[%c0, %c0_0] : memref<128x128xf32, #tpu.memory_space<vmem>>, vector<128x128xf32>
    %c0_1 = arith.constant 0 : index
    %c0_2 = arith.constant 0 : index
    %1 = vector.load %arg4[%c0_1, %c0_2] : memref<1x128xf32, #tpu.memory_space<vmem>>, vector<1x128xf32>
    %c0_3 = arith.constant 0 : index
    %c0_4 = arith.constant 0 : index
    %2 = vector.load %arg2[%c0_3, %c0_4] : memref<16x128xf32, #tpu.memory_space<vmem>>, vector<16x128xf32>
    %cst = arith.constant dense<0.000000e+00> : vector<16x128xf32>
    %3 = tpu.matmul %2, %0, %cst {dimension_numbers = #tpu.dot_dimension_numbers<[1], [0], [0], [1], [0, 0, 1, 1], [], []>} : vector<16x128xf32>, vector<128x128xf32>, vector<16x128xf32> -> vector<16x128xf32>
    %4 = vector.broadcast %1 : vector<1x128xf32> to vector<16x128xf32>
    %5 = arith.addf %3, %4 : vector<16x128xf32>
    %6 = math.tanh %5 : vector<16x128xf32>
    %c0_5 = arith.constant 0 : index
    %c0_6 = arith.constant 0 : index
    %7 = vector.load %arg5[%c0_5, %c0_6] : memref<16x128xf32, #tpu.memory_space<vmem>>, vector<16x128xf32>
    tpu.vector_store %arg5[%c0_5, %c0_6], %6 {strides = array<i32>} : memref<16x128xf32, #tpu.memory_space<vmem>>, vector<16x128xf32>,
    return
  }
  func.func @transform_0(%arg0: i32, %arg1: i32) -> (i32, i32) {
    %c0_i32 = arith.constant 0 : i32
    %c0_i32_0 = arith.constant 0 : i32
    return %arg1, %c0_i32 : i32, i32
  }
  func.func @transform_1(%arg0: i32, %arg1: i32) -> (i32, i32) {
    %c0_i32 = arith.constant 0 : i32
    %c0_i32_0 = arith.constant 0 : i32
    return %c0_i32, %arg0 : i32, i32
  }
  func.func @transform_2(%arg0: i32, %arg1: i32) -> (i32, i32) {
    %c0_i32 = arith.constant 0 : i32
    %c0_i32_0 = arith.constant 0 : i32
    return %c0_i32, %arg0 : i32, i32
  }
  func.func @transform_3(%arg0: i32, %arg1: i32) -> (i32, i32) {
    %c0_i32 = arith.constant 0 : i32
    return %arg1, %arg0 : i32, i32
  }
}

</mosaic_0001>

<bundles_post_ra>
// kernel: pooler_all.1
= control target key start
LH: loop header
LB: loop body
LE: loop exit
PB: predicated region body
PF: predicated region fallthrough
CT: control target
= control target key end

     0   :  { %s263_s1 = inlined_call_operand.vmem [shape: f32[128,128], index: 1, kind: input, shape index: {}]   ;;  %s264_s0 = inlined_call_operand.vmem [shape: f32[16,128], index: 0, kind: input, shape index: {}]   ;;  %s265_s2 = inlined_call_operand.vmem [shape: f32[1,128], index: 2, kind: input, shape index: {}]   ;;  %s266_s3 = inlined_call_operand.vmem [shape: f32[16,128], index: 3, kind: output, shape index: {}]  }
   0x1   :  { %v29_v0 = vld [vmem:[%s263_s1 + $0x78] sm:$0xff]  ;;  %v28_v1 = vld [vmem:[%s263_s1 + $0x70] sm:$0xff]  ;;  %v27_v2 = vld [vmem:[%s263_s1 + $0x68] sm:$0xff] }
   0x2   :  { %141 = vmatprep.subr.mxu0 %v29_v0  ;;  %v26_v3 = vld [vmem:[%s263_s1 + $0x60] sm:$0xff]  ;;  %v25_v5 = vld [vmem:[%s263_s1 + $0x58] sm:$0xff]  ;;  %v24_v6 = vld [vmem:[%s263_s1 + $0x50] sm:$0xff] }
   0x3   :  { %142 = vmatpush3.msra.mxu0 %v29_v0  ;;  %v31_v4 = vld [vmem:[%s264_s0] sm:$0xff]  ;;  %v23_v7 = vld [vmem:[%s263_s1 + $0x48] sm:$0xff]  ;;  %v21_v9 = vld [vmem:[%s263_s1 + $0x38] sm:$0xff] }
   0x4   :  { %143 = vmatprep.subr.mxu0 %v28_v1  ;;  %173 = vmatprep.mubr.f32.mxu0 %v31_v4  ;;  %v22_v8 = vld [vmem:[%s263_s1 + $0x40] sm:$0xff]  ;;  %v20_v10 = vld [vmem:[%s263_s1 + $0x30] sm:$0xff]  ;;  %v19_v11 = vld [vmem:[%s263_s1 + $0x28] sm:$0xff] }
   0x5   :  { %144 = vmatpush3.msra.mxu0 %v28_v1  ;;  %v18_v12 = vld [vmem:[%s263_s1 + $0x20] sm:$0xff]  ;;  %v17_v13 = vld [vmem:[%s263_s1 + $0x18] sm:$0xff]  ;;  %v16_v14 = vld [vmem:[%s263_s1 + $0x10] sm:$0xff] }
   0x6   :  { %145 = vmatprep.subr.mxu0 %v27_v2  ;;  %v15_v15 = vld [vmem:[%s263_s1 + $0x8] sm:$0xff]  ;;  %v14_v16 = vld [vmem:[%s263_s1] sm:$0xff] }
   0x7   :  { %146 = vmatpush3.msra.mxu0 %v27_v2  ;;  %v32_v17 = vld [vmem:[%s264_s0 + $0x8] sm:$0xff]  ;;  %v122_v18 = vld [vmem:[%s265_s2] ss:$0 sm:$0xff] }
   0x8   :  { %147 = vmatprep.subr.mxu0 %v26_v3 }
   0x9   :  { %148 = vmatpush3.msra.mxu0 %v26_v3 }
   0xa   :  { %149 = vmatprep.subr.mxu0 %v25_v5 }
   0xb   :  { %150 = vmatpush3.msra.mxu0 %v25_v5 }
   0xc   :  { %151 = vmatprep.subr.mxu0 %v24_v6 }
   0xd   :  { %152 = vmatpush3.msra.mxu0 %v24_v6 }
   0xe   :  { %153 = vmatprep.subr.mxu0 %v23_v7 }
   0xf   :  { %154 = vmatpush3.msra.mxu0 %v23_v7 }
  0x10   :  { %155 = vmatprep.subr.mxu0 %v22_v8 }
  0x11   :  { %156 = vmatpush3.msra.mxu0 %v22_v8 }
  0x12   :  { %157 = vmatprep.subr.mxu0 %v21_v9 }
  0x13   :  { %158 = vmatpush3.msra.mxu0 %v21_v9 }
  0x14   :  { %159 = vmatprep.subr.mxu0 %v20_v10 }
  0x15   :  { %160 = vmatpush3.msra.mxu0 %v20_v10 }
  0x16   :  { %161 = vmatprep.subr.mxu0 %v19_v11 }
  0x17   :  { %162 = vmatpush3.msra.mxu0 %v19_v11 }
  0x18   :  { %163 = vmatprep.subr.mxu0 %v18_v12 }
  0x19   :  { %164 = vmatpush3.msra.mxu0 %v18_v12 }
  0x1a   :  { %165 = vmatprep.subr.mxu0 %v17_v13 }
  0x1b   :  { %166 = vmatpush3.msra.mxu0 %v17_v13 }
  0x1c   :  { %167 = vmatprep.subr.mxu0 %v16_v14 }
  0x1d   :  { %168 = vmatpush3.msra.mxu0 %v16_v14 }
  0x1e   :  { %169 = vmatprep.subr.mxu0 %v15_v15 }
  0x1f   :  { %170 = vmatpush3.msra.mxu0 %v15_v15 }
  0x20   :  { %171 = vmatprep.subr.mxu0 %v14_v16 }
  0x21   :  { %172 = vmatpush3.msra.mxu0 %v14_v16 }
  0x22   :  { %174 = vmatmul.mubr.f32.vlgmr.msra.gmra.mxu0 %v32_v17 }
  0xe2   :  { %v175_v19 = vpop.f32.mrf.mxu0 }
  0xe3   :  { %v111_v20 = vadd.f32 %v175_v19, %v122_v18 }
  0xe4   :  { %v105_v21 = vpop.f32.mrf.mxu0 }
  0xe5   :  { %176 = vtanh.f32 %v111_v20  ;;  %v106_v22 = vadd.f32 %v122_v18, %v105_v21 }
  0xe7   :  { %178 = vtanh.f32 %v106_v22 }
  0xf2   :  { %v177_v23 = vpop.eup %176 }
  0xf3   :  { %117 = vst [vmem:[%s266_s3 + $0x8] sm:$0xff] %v177_v23 }
  0xf4   :  { %v179_v24 = vpop.eup %178 }
  0xf5   :  { %116 = vst [vmem:[%s266_s3] sm:$0xff] %v179_v24 }

</bundles_post_ra>
